<compile_context>
chip_gen: v7x
topology: tpu7x:2x2x1
jax: 0.10.0
libtpu: 0.0.40
codegen_flags: <defaults>
</compile_context>

<pallas_src>
import functools

import jax
import jax.numpy as jnp
from jax import lax
from jax.experimental import pallas as pl
from jax.experimental.pallas import tpu as pltpu


def _round_up(n, m):
    return ((n + m - 1) // m) * m


def input_projection_kernel(x_ref, w_ih_ref, b_ref, gin_ref):
    # x_ref: (rows, D); w_ih_ref: (D, 4H); b_ref: (1, 4H); gin_ref: (rows, 4H)
    gin_ref[...] = (
        jnp.dot(x_ref[...], w_ih_ref[...], preferred_element_type=jnp.float32)
        + b_ref[...]
    )


def lstm_recurrence_kernel(gin_ref, w_hh_ref, h0_ref, c0_ref, h_ref, c_ref, *,
                           time_chunk, seq_len, hidden, mask_tail):
    chunk = pl.program_id(0)

    # Initialize the VMEM-resident carry once; constant out index_maps keep it resident.
    @pl.when(chunk == 0)
    def _():
        h_ref[...] = h0_ref[...]
        c_ref[...] = c0_ref[...]

    w_hh = w_hh_ref[...]  # (H, 4H), resident across the whole grid

    def step(t, carry):
        h, c = carry
        # gates: (B_pad, 4H) = precomputed input projection + recurrent projection
        gates = gin_ref[t] + jnp.dot(h, w_hh, preferred_element_type=jnp.float32)
        # PyTorch gate ordering: i, f, g, o
        i_g = jax.nn.sigmoid(gates[:, 0 * hidden:1 * hidden])
        f_g = jax.nn.sigmoid(gates[:, 1 * hidden:2 * hidden])
        g_g = jnp.tanh(gates[:, 2 * hidden:3 * hidden])
        o_g = jax.nn.sigmoid(gates[:, 3 * hidden:4 * hidden])
        c_new = f_g * c + i_g * g_g
        h_new = o_g * jnp.tanh(c_new)
        if mask_tail:
            valid = (chunk * time_chunk + t) < seq_len
            h_new = jnp.where(valid, h_new, h)
            c_new = jnp.where(valid, c_new, c)
        return h_new, c_new

    h, c = lax.fori_loop(0, time_chunk, step, (h_ref[...], c_ref[...]),
                         unroll=min(time_chunk, 8))
    h_ref[...] = h
    c_ref[...] = c


def encoder_lstm_forward(x, h0, c0, w_ih, w_hh, b_ih, b_hh, *, time_chunk=32):
    """x: (T, B, D); h0/c0: (1, B, H); w_ih: (4H, D); w_hh: (4H, H); b_*: (4H,).

    Returns (h_T, c_T), each of shape (1, B, H), matching PyTorch nn.LSTM.
    """
    T, B, D = x.shape
    H = h0.shape[-1]
    G = 4 * H
    f32 = jnp.float32

    x = jnp.asarray(x, f32)

    # Pad batch to a sublane multiple (8) so state / gate tiles are sublane-dense.
    B_pad = max(8, _round_up(B, 8))
    # Chunk time: one grid step per chunk instead of per timestep.
    tc = max(1, min(time_chunk, T))
    T_pad = _round_up(T, tc)
    num_chunks = T_pad // tc

    x_pad = jnp.pad(x, ((0, T_pad - T), (0, B_pad - B), (0, 0)))

    # MXU-friendly right-multiply layouts; fold the two biases together once.
    w_ih_t = jnp.asarray(w_ih, f32).T                    # (D, 4H)
    w_hh_t = jnp.asarray(w_hh, f32).T                    # (H, 4H)
    bias = (jnp.asarray(b_ih, f32) + jnp.asarray(b_hh, f32)).reshape(1, G)

    h0_p = jnp.pad(jnp.asarray(h0, f32).reshape(B, H), ((0, B_pad - B), (0, 0)))
    c0_p = jnp.pad(jnp.asarray(c0, f32).reshape(B, H), ((0, B_pad - B), (0, 0)))

    # -------- Phase 1: time-parallel input projection (one big matmul) --------
    rows = tc * B_pad
    x2 = x_pad.reshape(T_pad * B_pad, D)
    gin2 = pl.pallas_call(
        input_projection_kernel,
        out_shape=jax.ShapeDtypeStruct((T_pad * B_pad, G), f32),
        grid_spec=pltpu.PrefetchScalarGridSpec(
            num_scalar_prefetch=0,
            grid=(num_chunks,),
            in_specs=[
                pl.BlockSpec((rows, D), lambda i: (i, 0)),   # x rows for chunk i
                pl.BlockSpec((D, G), lambda i: (0, 0)),      # W_ih^T (resident)
                pl.BlockSpec((1, G), lambda i: (0, 0)),      # fused bias
            ],
            out_specs=pl.BlockSpec((rows, G), lambda i: (i, 0)),
        ),
        compiler_params=pltpu.CompilerParams(
            dimension_semantics=("parallel",)),
    )(x2, w_ih_t, bias)
    gin = gin2.reshape(T_pad, B_pad, G)

    # -------- Phase 2: sequential recurrence over time chunks --------
    kernel = functools.partial(
        lstm_recurrence_kernel,
        time_chunk=tc, seq_len=T, hidden=H, mask_tail=(T_pad != T))
    h_fin, c_fin = pl.pallas_call(
        kernel,
        out_shape=(jax.ShapeDtypeStruct((B_pad, H), f32),
                   jax.ShapeDtypeStruct((B_pad, H), f32)),
        grid_spec=pltpu.PrefetchScalarGridSpec(
            num_scalar_prefetch=0,
            grid=(num_chunks,),
            in_specs=[
                pl.BlockSpec((tc, B_pad, G), lambda i: (i, 0, 0)),  # G_in chunk
                pl.BlockSpec((H, G), lambda i: (0, 0)),             # W_hh^T (resident)
                pl.BlockSpec((B_pad, H), lambda i: (0, 0)),         # h0
                pl.BlockSpec((B_pad, H), lambda i: (0, 0)),         # c0
            ],
            out_specs=[
                pl.BlockSpec((B_pad, H), lambda i: (0, 0)),         # h carry / out
                pl.BlockSpec((B_pad, H), lambda i: (0, 0)),         # c carry / out
            ],
        ),
        compiler_params=pltpu.CompilerParams(
            dimension_semantics=("arbitrary",)),
    )(gin, w_hh_t, h0_p, c0_p)

    # Strip batch padding; match PyTorch (num_layers=1, B, H).
    return h_fin[:B].reshape(1, B, H), c_fin[:B].reshape(1, B, H)


def lstm_reference(x, h0, c0, w_ih, w_hh, b_ih, b_hh):
    """Pure-JAX reference of PyTorch single-layer LSTM final (h, c)."""
    H = h0.shape[-1]
    b = b_ih + b_hh

    def step(carry, x_t):
        h, c = carry
        gates = x_t @ w_ih.T + h @ w_hh.T + b
        i = jax.nn.sigmoid(gates[:, 0 * H:1 * H])
        f = jax.nn.sigmoid(gates[:, 1 * H:2 * H])
        g = jnp.tanh(gates[:, 2 * H:3 * H])
        o = jax.nn.sigmoid(gates[:, 3 * H:4 * H])
        c_new = f * c + i * g
        h_new = o * jnp.tanh(c_new)
        return (h_new, c_new), None

    (h_f, c_f), _ = jax.lax.scan(step, (h0[0], c0[0]), x)
    return h_f[None], c_f[None]


if __name__ == "__main__":
    T, B, D, H = 8, 2, 8, 32   # seq=8, batch=2, latent_dim=8, hidden_dim=32

    key = jax.random.PRNGKey(0)
    k_x, k_h, k_c, k_wih, k_whh, k_bih, k_bhh = jax.random.split(key, 7)

    # Deterministic synthetic parameters (same shapes as nn.LSTM(D, H)).
    scale = 1.0 / jnp.sqrt(jnp.float32(H))
    x = jax.random.normal(k_x, (T, B, D), jnp.float32)
    h0 = jax.random.normal(k_h, (1, B, H), jnp.float32)
    c0 = jax.random.normal(k_c, (1, B, H), jnp.float32)
    w_ih = jax.random.uniform(k_wih, (4 * H, D), jnp.float32, -scale, scale)
    w_hh = jax.random.uniform(k_whh, (4 * H, H), jnp.float32, -scale, scale)
    b_ih = jax.random.uniform(k_bih, (4 * H,), jnp.float32, -scale, scale)
    b_hh = jax.random.uniform(k_bhh, (4 * H,), jnp.float32, -scale, scale)

    h_out, c_out = encoder_lstm_forward(x, h0, c0, w_ih, w_hh, b_ih, b_hh)
    jax.block_until_ready((h_out, c_out))

    h_ref, c_ref = lstm_reference(x, h0, c0, w_ih, w_hh, b_ih, b_hh)
    assert h_out.shape == (1, B, H) and c_out.shape == (1, B, H)
    assert jnp.allclose(h_out, h_ref, atol=1e-5, rtol=1e-5)
    assert jnp.allclose(c_out, c_ref, atol=1e-5, rtol=1e-5)

    print("KERNEL_OK")
</pallas_src>

<mosaic_0001>
module attributes {stable_mosaic.version = 11 : i64} {
  func.func @input_projection_kernel(%arg0: i32, %arg1: memref<64x8xf32, #tpu.memory_space<vmem>>, %arg2: memref<8x128xf32, #tpu.memory_space<vmem>>, %arg3: memref<1x128xf32, #tpu.memory_space<vmem>>, %arg4: memref<64x128xf32, #tpu.memory_space<vmem>>) attributes {dimension_semantics = [#tpu.dimension_semantics<parallel>], iteration_bounds = array<i64: 1>, scalar_prefetch = 0 : i64, scratch_operands = 0 : i64, tpu.core_type = #tpu.core_type<tc>, window_params = [{transform_indices = @transform_0, window_bounds = array<i64: 64, 8>}, {pipeline_mode = #tpu.pipeline_mode<synchronous>, transform_indices = @transform_1, window_bounds = array<i64: 8, 128>}, {pipeline_mode = #tpu.pipeline_mode<synchronous>, transform_indices = @transform_2, window_bounds = array<i64: 1, 128>}, {transform_indices = @transform_3, window_bounds = array<i64: 64, 128>}]} {
    %c0 = arith.constant 0 : index
    %c0_0 = arith.constant 0 : index
    %0 = vector.load %arg1[%c0, %c0_0] : memref<64x8xf32, #tpu.memory_space<vmem>>, vector<64x8xf32>
    %c0_1 = arith.constant 0 : index
    %c0_2 = arith.constant 0 : index
    %1 = vector.load %arg2[%c0_1, %c0_2] : memref<8x128xf32, #tpu.memory_space<vmem>>, vector<8x128xf32>
    %cst = arith.constant dense<0.000000e+00> : vector<64x128xf32>
    %2 = tpu.matmul %0, %1, %cst {dimension_numbers = #tpu.dot_dimension_numbers<[1], [0], [0], [1], [0, 0, 1, 1], [], []>} : vector<64x8xf32>, vector<8x128xf32>, vector<64x128xf32> -> vector<64x128xf32>
    %c0_3 = arith.constant 0 : index
    %c0_4 = arith.constant 0 : index
    %3 = vector.load %arg3[%c0_3, %c0_4] : memref<1x128xf32, #tpu.memory_space<vmem>>, vector<1x128xf32>
    %4 = vector.broadcast %3 : vector<1x128xf32> to vector<64x128xf32>
    %5 = arith.addf %2, %4 : vector<64x128xf32>
    %c0_5 = arith.constant 0 : index
    %c0_6 = arith.constant 0 : index
    %6 = vector.load %arg4[%c0_5, %c0_6] : memref<64x128xf32, #tpu.memory_space<vmem>>, vector<64x128xf32>
    tpu.vector_store %arg4[%c0_5, %c0_6], %5 {strides = array<i32>} : memref<64x128xf32, #tpu.memory_space<vmem>>, vector<64x128xf32>,
    return
  }
  func.func @transform_0(%arg0: i32) -> (i32, i32) {
    %c0_i32 = arith.constant 0 : i32
    %c0_i32_0 = arith.constant 0 : i32
    return %arg0, %c0_i32 : i32, i32
  }
  func.func @transform_1(%arg0: i32) -> (i32, i32) {
    %c0_i32 = arith.constant 0 : i32
    %c0_i32_0 = arith.constant 0 : i32
    %c0_i32_1 = arith.constant 0 : i32
    return %c0_i32, %c0_i32_0 : i32, i32
  }
  func.func @transform_2(%arg0: i32) -> (i32, i32) {
    %c0_i32 = arith.constant 0 : i32
    %c0_i32_0 = arith.constant 0 : i32
    %c0_i32_1 = arith.constant 0 : i32
    return %c0_i32, %c0_i32_0 : i32, i32
  }
  func.func @transform_3(%arg0: i32) -> (i32, i32) {
    %c0_i32 = arith.constant 0 : i32
    %c0_i32_0 = arith.constant 0 : i32
    return %arg0, %c0_i32 : i32, i32
  }
}

</mosaic_0001>

<bundles_post_ra>
// kernel: tpu_custom_call.1
= control target key start
LH: loop header
LB: loop body
LE: loop exit
PB: predicated region body
PF: predicated region fallthrough
CT: control target
= control target key end

     0   :  { %vm31_vm0 = vcmask 64512   ;;  %s319_s0 = inlined_call_operand.vmem [shape: f32[64,8], index: 0, kind: input, shape index: {}]   ;;  %s320_s1 = inlined_call_operand.vmem [shape: f32[8,128], index: 1, kind: input, shape index: {}]   ;;  %s321_s2 = inlined_call_operand.vmem [shape: f32[1,128], index: 2, kind: input, shape index: {}]   ;;  %s322_s3 = inlined_call_operand.hbm [shape: f32[64,128], index: 3, kind: output, shape index: {}]  }
   0x1   :  { %v23_v0 = vld [vmem:[%s320_s1] sm:$0xff]  ;;  %v16_v3 = vld [vmem:[%s319_s0 + $0x8] sm:$0xff]  ;;  %v17_v5 = vld [vmem:[%s319_s0 + $0x10] sm:$0xff] }
   0x2   :  { %v15_v1 = vld [vmem:[%s319_s0] sm:$0xff]  ;;  %203 = vmatprep.subr.mxu0 %v23_v0  ;;  %217 = vmatprep.subr.mxu1 %v23_v0  ;;  %v20_v4 = vld [vmem:[%s319_s0 + $0x28] sm:$0xff]  ;;  %v21_v6 = vld [vmem:[%s319_s0 + $0x30] sm:$0xff] }
   0x3   :  { %v19_v2 = vld [vmem:[%s319_s0 + $0x20] sm:$0xff]  ;;  %204 = vmatpush3.msra.mxu0 %v23_v0  ;;  %218 = vmatpush3.msra.mxu1 %v23_v0 }
   0x4   :  { %205 = vmatprep.mubr.msk.f32.mxu0 %vm31_vm0, %v15_v1  ;;  %211 = vmatprep.mubr.msk.f32.mxu1 %vm31_vm0, %v19_v2 }
   0x5   :  { %8 = vsyncpa [#allocation3], 0  ;;  %206 = vmatmul.mubr.msk.f32.vlgmr.msra.gmra.mrb[0].mxu0 %vm31_vm0, %v16_v3  ;;  %212 = vmatmul.mubr.msk.f32.vlgmr.msra.gmra.mrb[0].mxu1 %vm31_vm0, %v20_v4  ;;  %v18_v7 = vld [vmem:[%s319_s0 + $0x18] sm:$0xff]  ;;  %v185_v9 = vld [vmem:[%s321_s2] ss:$0 sm:$0xff]  ;;  %s246_s4 = smov [#allocation2]  }
   0x6   :  { %208 = vmatprep.mubr.msk.f32.mxu0 %vm31_vm0, %v17_v5  ;;  %214 = vmatprep.mubr.msk.f32.mxu1 %vm31_vm0, %v21_v6  ;;  %v22_v8 = vld [vmem:[%s319_s0 + $0x38] sm:$0xff]  ;;  %s174_s5 = sshll.u32 %s246_s4, 4  ;;  %s175_s5 = int_to_ptr.vmem [resolvable:$true] %s174_s5 }
   0x7   :  { %s222_s0 = scalar_lea.vmem %s175_s5, 1024  ;;  %p227_p1 = scmp.lt.s32.totalorder %s175_s5, %s175_s5 }
   0x8   :  { %p223_p0 = scmp.ne.s32.totalorder %s175_s5, %s222_s0  ;;  %p228_p2 = scmp.lt.s32.totalorder %s222_s0, %s222_s0 }
   0x9   :  { %209 = vmatmul.mubr.msk.f32.gmra.mrb[2].mxu0 %vm31_vm0, %v18_v7  ;;  %215 = vmatmul.mubr.msk.f32.gmra.mrb[2].mxu1 %vm31_vm0, %v22_v8 }
   0xa   :  { %p229_p3 = por %p228_p2, %p227_p1 }
   0xc   :  { %p230_p4 = pnand %p229_p3, %p223_p0 }
  0xd8   :  { %v207_v10 = vpop.f32.mrb[0].mxu0  ;;  %v213_v11 = vpop.f32.mrb[0].mxu1 }
  0xd9   :  { %v128_v12 = vadd.f32 %v207_v10, %v185_v9  ;;  %v148_v13 = vadd.f32 %v213_v11, %v185_v9  ;;  %v122_v14 = vpop.f32.mrb[1].mxu0  ;;  %v142_v15 = vpop.f32.mrb[1].mxu1 }
  0xda   :  { %v123_v16 = vadd.f32 %v185_v9, %v122_v14  ;;  %v143_v17 = vadd.f32 %v185_v9, %v142_v15 }
  0xdb   :  { %162 = vst [vmem:[#allocation2 + $0x8] sm:$0xff] %v128_v12  ;;  %166 = vst [vmem:[#allocation2 + $0x28] sm:$0xff] %v148_v13 }
  0xdc   :  { %161 = vst [vmem:[#allocation2] sm:$0xff] %v123_v16  ;;  %165 = vst [vmem:[#allocation2 + $0x20] sm:$0xff] %v143_v17  ;;  %v210_v18 = vpop.f32.mrb[2].mxu0  ;;  %v216_v19 = vpop.f32.mrb[2].mxu1 }
  0xdd   :  { %v138_v20 = vadd.f32 %v210_v18, %v185_v9  ;;  %v158_v21 = vadd.f32 %v216_v19, %v185_v9  ;;  %v132_v22 = vpop.f32.mrb[3].mxu0  ;;  %v152_v23 = vpop.f32.mrb[3].mxu1 }
  0xde   :  { %v133_v24 = vadd.f32 %v185_v9, %v132_v22  ;;  %v153_v25 = vadd.f32 %v185_v9, %v152_v23 }
  0xdf   :  { %164 = vst [vmem:[#allocation2 + $0x18] sm:$0xff] %v138_v20  ;;  %168 = vst [vmem:[#allocation2 + $0x38] sm:$0xff] %v158_v21 }
  0xe0   :  { %163 = vst [vmem:[#allocation2 + $0x10] sm:$0xff] %v133_v24  ;;  %167 = vst [vmem:[#allocation2 + $0x30] sm:$0xff] %v153_v25 }
  0xe1   :  { %233 = shalt.err (!%p230_p4)
}
  0xe2   :  { %s234_s7 = scalar_lea.hbm %s322_s3, 1024 }
  0xe3   :  { %p235_p5 = scmp.ne.s32.totalorder %s322_s3, %s234_s7  ;;  %p238_p6 = scmp.lt.u32.totalorder %s234_s7, %s322_s3 }
  0xe5   :  { %p240_p7 = pnand %p238_p6, %p235_p5 }
  0xe7   :  { %243 = shalt.err (!%p240_p7)
}
  0xe8   :  { %s247_s12 = smov 128   ;;  %s248_s13 = smov 8  }
  0xe9   :  { %180 = dma.vmem_to_hbm [thread:$0]  %s175_s5, 1024, %s322_s3, [#allocation3], %s247_s12, %s247_s12, %s248_s13  }
  0xea   :  { %244 = dma.done.wait [#allocation3], 1024  }
  0xeb   :  { %245 = vsyncadd [#allocation3], 4294966272 }
  0xec   :  { %184 = vsyncpa [#allocation3], 1 }

</bundles_post_ra>
